<compile_context>
chip_gen: v5e
topology: v5e:2x2
jax: 0.10.0
libtpu: 0.0.40
codegen_flags: <defaults>
</compile_context>

<pallas_src>
import functools

import jax
import jax.numpy as jnp
import numpy as np
from jax import lax
from jax.experimental import pallas as pl
from jax.experimental.pallas import tpu as pltpu


def _round_up(v: int, m: int) -> int:
    return -(-v // m) * m


# --------------------------------------------------------------------------
# Kernel bodies (lane-dense (C, TILE_N) layout)
# --------------------------------------------------------------------------
def _tile_bin_sums(x_ref, y_ref, *, n_bins: int, n_total: int, nb_out: int):
    """Per-tile per-bin (conf_sum, acc_sum) as a (2, nb_out) lane-dense array.

    x_ref: (C, TILE_N) logits (any float dtype; upcast to f32 in-kernel)
    y_ref: (1, TILE_N) int32 labels
    """
    x = x_ref[...].astype(jnp.float32)                    # (c, tn), f32 math
    y = y_ref[...]                                        # (1, tn) int32
    c, tn = x.shape

    # --- prediction (first-occurrence argmax over classes, matches torch.max)
    col_max = jnp.max(x, axis=0, keepdims=True)                      # (1, tn)
    cls_idx = lax.broadcasted_iota(jnp.int32, (c, tn), 0)
    pred = jnp.min(jnp.where(x == col_max, cls_idx, jnp.int32(c)),
                   axis=0, keepdims=True)                            # (1, tn)
    acc = (pred == y).astype(jnp.float32)                            # (1, tn)

    # --- confidence = max softmax prob = 1 / sum(exp(x - max)) --------------
    # exact reciprocal on purpose: approx recip could move a confidence
    # across a bin boundary.
    denom = jnp.sum(jnp.exp(x - col_max), axis=0, keepdims=True)     # (1, tn)
    conf = 1.0 / denom

    # --- mask padded columns (only emitted when the last tile is partial) ---
    if n_total % tn != 0:
        col = lax.broadcasted_iota(jnp.int32, (1, tn), 1)
        valid = (pl.program_id(0) * tn + col) < n_total              # (1, tn)
        conf = jnp.where(valid, conf, 0.0)   # also scrubs NaN/Inf from garbage
        acc = jnp.where(valid, acc, 0.0)

    # --- binning on (0, 1]: bin = clamp(ceil(conf*n_bins) - 1, 0, nb-1) -----
    bin_idx = jnp.clip(jnp.ceil(conf * n_bins).astype(jnp.int32) - 1,
                       0, n_bins - 1)                                # (1, tn)
    nb_sub = _round_up(n_bins, 8)              # small sublane-padded one-hot
    bins = lax.broadcasted_iota(jnp.int32, (nb_sub, tn), 0)
    in_bin = (bins == bin_idx).astype(jnp.float32)                   # (nb, tn)
    # (masked columns have conf == acc == 0, so whatever bin they hash to
    #  contributes 0; padded one-hot rows >= n_bins are never hit.)

    # --- per-bin sums on the (otherwise idle) MXU ---------------------------
    stacked = jnp.concatenate([conf, acc], axis=0)                   # (2, tn)
    sums = lax.dot_general(stacked, in_bin,
                           (((1,), (1,)), ((), ())),
                           preferred_element_type=jnp.float32)       # (2, nb)

    # --- pad bin axis to a lane-dense width for the store -------------------
    if nb_out > nb_sub:
        sums = jnp.concatenate(
            [sums, jnp.zeros((2, nb_out - nb_sub), jnp.float32)], axis=1)
    return sums                                                      # (2, nb_out)


def _ece_accum_kernel(x_ref, y_ref, out_ref, *, n_bins: int, n_total: int):
    """Single resident (2, nb_out) accumulator across the grid (v5e/v6e path)."""
    sums = _tile_bin_sums(x_ref, y_ref, n_bins=n_bins, n_total=n_total,
                          nb_out=out_ref.shape[-1])

    @pl.when(pl.program_id(0) == 0)
    def _():
        out_ref[...] = jnp.zeros_like(out_ref)

    out_ref[...] += sums


def _ece_partial_kernel(x_ref, y_ref, out_ref, *, n_bins: int, n_total: int):
    """Per-tile (1, 2, nb_out) partials (disjoint blocks -> core-parallel OK)."""
    sums = _tile_bin_sums(x_ref, y_ref, n_bins=n_bins, n_total=n_total,
                          nb_out=out_ref.shape[-1])
    out_ref[...] = sums.reshape(1, *sums.shape)


# --------------------------------------------------------------------------
# Host-side sizing helpers
# --------------------------------------------------------------------------
def _default_vmem_limit() -> int:
    """Scoped-VMEM limit: ~3/4 of physical, capped at 64 MiB (v7x => 48 MiB)."""
    phys = 128 * 1024 * 1024
    try:
        phys = int(pltpu.get_tpu_info().vmem_capacity_bytes)
    except Exception:
        phys = 64 * 1024 * 1024      # conservative (v7x per-TensorCore)
    return min(64 * 1024 * 1024, (phys * 3) // 4)


def _pick_tile_n(c: int, in_bytes: int, n_bins: int, budget_bytes: int) -> int:
    """Largest lane-dense column tile fitting the working-set budget."""
    c8 = _round_up(max(c, 1), 8)
    nb_sub = _round_up(n_bins, 8)
    per_col = (c8 * in_bytes * 2      # logits tile, double-buffered
               + 4 * 2                # label lane (int32), double-buffered
               + c8 * 4 * 3           # f32 upcast + exp/compare temporaries
               + nb_sub * 4           # one-hot in_bin rows (f32)
               + 12 * 4)              # assorted (1, TILE_N) vectors
    tile = budget_bytes // per_col
    return max(128, min(16384, (tile // 128) * 128))


# --------------------------------------------------------------------------
# Public entry point
# --------------------------------------------------------------------------
def ece_loss(y_pred: jax.Array, y_true: jax.Array, n_bins: int = 15, *,
             tile_n: int | None = None,
             multicore: bool = False,
             vmem_limit_bytes: int | None = None) -> jax.Array:
    """Pallas ECE loss. y_pred: (N, C) logits, y_true: (N,) int labels.

    multicore=True writes per-tile partial blocks and marks the tile axis
    CORE_PARALLEL so v7x's two TensorCores split the grid; the default path
    (single-TC v5e/v6e) keeps one resident VMEM accumulator instead.
    """
    n, c = y_pred.shape
    nb_sub = _round_up(n_bins, 8)
    nb_out = _round_up(nb_sub, 128)      # lane-dense output width

    if vmem_limit_bytes is None:
        vmem_limit_bytes = _default_vmem_limit()
    if tile_n is None:
        tile_n = _pick_tile_n(c, jnp.dtype(y_pred.dtype).itemsize, n_bins,
                              budget_bytes=min(24 << 20, vmem_limit_bytes // 2))
    tile_n = int(tile_n)
    if tile_n >= n:
        tile_n = n                               # single full-extent block
    else:
        tile_n = max(128, (tile_n // 128) * 128)  # lane rule: multiple of 128
        if tile_n >= n:
            tile_n = n
    num_tiles = pl.cdiv(n, tile_n)

    # Lane-dense layout: logits (C, N), labels (1, N).
    xt = y_pred.T
    yt = y_true.reshape(1, n).astype(jnp.int32)

    in_specs = [
        pl.BlockSpec((c, tile_n), lambda i: (0, i)),
        pl.BlockSpec((1, tile_n), lambda i: (0, i)),
    ]

    if multicore:
        kernel = functools.partial(_ece_partial_kernel, n_bins=n_bins, n_total=n)
        out_shape = jax.ShapeDtypeStruct((num_tiles, 2, nb_out), jnp.float32)
        out_specs = pl.BlockSpec((1, 2, nb_out), lambda i: (i, 0, 0))
        dim_sem = (pltpu.CORE_PARALLEL,)          # shard tile axis across TCs
    else:
        kernel = functools.partial(_ece_accum_kernel, n_bins=n_bins, n_total=n)
        out_shape = jax.ShapeDtypeStruct((2, nb_out), jnp.float32)
        out_specs = pl.BlockSpec((2, nb_out), lambda i: (0, 0))
        dim_sem = ("arbitrary",)                  # resident accumulator

    out = pl.pallas_call(
        kernel,
        out_shape=out_shape,
        grid=(num_tiles,),
        in_specs=in_specs,
        out_specs=out_specs,
        compiler_params=pltpu.CompilerParams(
            dimension_semantics=dim_sem,
            vmem_limit_bytes=int(vmem_limit_bytes),
        ),
    )(xt, yt)

    total = out.sum(axis=0) if multicore else out          # (2, nb_out)
    ece = jnp.sum(jnp.abs(total[0, :n_bins] - total[1, :n_bins])) / jnp.float32(n)
    return ece.reshape(1)    # match torch's shape-(1,) output


# --------------------------------------------------------------------------
# Pure-JAX reference mirroring the PyTorch module
# --------------------------------------------------------------------------
def _ece_ref(y_pred, y_true, n_bins=15):
    sm = jax.nn.softmax(y_pred, axis=1)
    conf = jnp.max(sm, axis=1)
    pred = jnp.argmax(sm, axis=1)
    acc = (pred == y_true).astype(jnp.float32)
    boundaries = np.linspace(0.0, 1.0, n_bins + 1)
    ece = jnp.zeros((1,), jnp.float32)
    n = y_pred.shape[0]
    for i in range(n_bins):
        in_bin = (conf > boundaries[i]) & (conf <= boundaries[i + 1])
        ece = ece + jnp.abs(jnp.sum(conf * in_bin) - jnp.sum(acc * in_bin)) / n
    return ece


if __name__ == "__main__":
    key = jax.random.PRNGKey(0)
    k1, k2 = jax.random.split(key)
    N, C = 300, 10
    y_pred = jax.random.normal(k1, (N, C), dtype=jnp.float32) * 3.0
    y_true = jax.random.randint(k2, (N,), 0, C, dtype=jnp.int32)

    # auto-tile path: single full-extent block at this size
    out_auto = ece_loss(y_pred, y_true, n_bins=15)
    # tiled path: 3 column-tiles of 128, last one partial (masked in-kernel)
    out_tiled = ece_loss(y_pred, y_true, n_bins=15, tile_n=128)
    # bf16 logits straight into the kernel (no wrapper upcast)
    out_bf16 = ece_loss(y_pred.astype(jnp.bfloat16), y_true, n_bins=15, tile_n=128)
    # NOTE: on v7x, call with multicore=True to use both TensorCores
    # (per-tile partial outputs + pltpu.CORE_PARALLEL); not exercised here.
    jax.block_until_ready((out_auto, out_tiled, out_bf16))

    ref = _ece_ref(y_pred, y_true, n_bins=15)
    ref_bf16 = _ece_ref(y_pred.astype(jnp.bfloat16).astype(jnp.float32),
                        y_true, n_bins=15)

    np.testing.assert_allclose(np.asarray(out_auto), np.asarray(ref),
                               atol=1e-5, rtol=1e-5)
    np.testing.assert_allclose(np.asarray(out_tiled), np.asarray(ref),
                               atol=1e-5, rtol=1e-5)
    np.testing.assert_allclose(np.asarray(out_bf16), np.asarray(ref_bf16),
                               atol=1e-5, rtol=1e-5)
    print("KERNEL_OK")
</pallas_src>

<mosaic_0001>
module attributes {stable_mosaic.version = 11 : i64} {
  func.func @_ece_accum_kernel(%arg0: i32, %arg1: memref<10x300xf32, #tpu.memory_space<vmem>>, %arg2: memref<1x300xi32, #tpu.memory_space<vmem>>, %arg3: memref<2x128xf32, #tpu.memory_space<vmem>>) attributes {dimension_semantics = [#tpu.dimension_semantics<arbitrary>], iteration_bounds = array<i64: 1>, scalar_prefetch = 0 : i64, scratch_operands = 0 : i64, tpu.core_type = #tpu.core_type<tc>, window_params = [{transform_indices = @transform_0, window_bounds = array<i64: 10, 300>}, {transform_indices = @transform_1, window_bounds = array<i64: 1, 300>}, {pipeline_mode = #tpu.pipeline_mode<synchronous>, transform_indices = @transform_2, window_bounds = array<i64: 2, 128>}]} {
    %c0 = arith.constant 0 : index
    %c0_0 = arith.constant 0 : index
    %0 = vector.load %arg1[%c0, %c0_0] : memref<10x300xf32, #tpu.memory_space<vmem>>, vector<10x300xf32>
    %c0_1 = arith.constant 0 : index
    %c0_2 = arith.constant 0 : index
    %1 = vector.load %arg2[%c0_1, %c0_2] : memref<1x300xi32, #tpu.memory_space<vmem>>, vector<1x300xi32>
    %cst = arith.constant dense<0xFF800000> : vector<300xf32>
    %2 = vector.multi_reduction <maximumf>, %0, %cst [0] : vector<10x300xf32> to vector<300xf32>
    %3 = vector.shape_cast %2 : vector<300xf32> to vector<1x300xf32>
    %4 = tpu.iota {dimensions = array<i32: 0>} : vector<10x300xi32>
    %5 = vector.broadcast %3 : vector<1x300xf32> to vector<10x300xf32>
    %6 = arith.cmpf oeq, %0, %5 : vector<10x300xf32>
    %c10_i32 = arith.constant 10 : i32
    %7 = vector.broadcast %c10_i32 : i32 to vector<10x300xi32>
    %8 = arith.select %6, %4, %7 : vector<10x300xi1>, vector<10x300xi32>
    %cst_3 = arith.constant dense<2147483647> : vector<300xi32>
    %9 = vector.multi_reduction <minsi>, %8, %cst_3 [0] : vector<10x300xi32> to vector<300xi32>
    %10 = vector.shape_cast %9 : vector<300xi32> to vector<1x300xi32>
    %11 = arith.cmpi eq, %10, %1 : vector<1x300xi32>
    %12 = arith.extui %11 : vector<1x300xi1> to vector<1x300xi32>
    %13 = arith.sitofp %12 : vector<1x300xi32> to vector<1x300xf32>
    %14 = vector.broadcast %3 : vector<1x300xf32> to vector<10x300xf32>
    %15 = arith.subf %0, %14 : vector<10x300xf32>
    %16 = math.exp %15 : vector<10x300xf32>
    %cst_4 = arith.constant dense<0.000000e+00> : vector<300xf32>
    %17 = vector.multi_reduction <add>, %16, %cst_4 [0] : vector<10x300xf32> to vector<300xf32>
    %18 = vector.shape_cast %17 : vector<300xf32> to vector<1x300xf32>
    %cst_5 = arith.constant 1.000000e+00 : f32
    %19 = vector.broadcast %cst_5 : f32 to vector<1x300xf32>
    %20 = arith.divf %19, %18 : vector<1x300xf32>
    %cst_6 = arith.constant 1.500000e+01 : f32
    %21 = vector.broadcast %cst_6 : f32 to vector<1x300xf32>
    %22 = arith.mulf %20, %21 : vector<1x300xf32>
    %23 = math.ceil %22 : vector<1x300xf32>
    %24 = arith.fptosi %23 : vector<1x300xf32> to vector<1x300xi32>
    %c1_i32 = arith.constant 1 : i32
    %25 = vector.broadcast %c1_i32 : i32 to vector<1x300xi32>
    %26 = arith.subi %24, %25 : vector<1x300xi32>
    %c0_i32 = arith.constant 0 : i32
    %c14_i32 = arith.constant 14 : i32
    %27 = vector.broadcast %c0_i32 : i32 to vector<1x300xi32>
    %28 = arith.maxsi %27, %26 : vector<1x300xi32>
    %29 = vector.broadcast %c14_i32 : i32 to vector<1x300xi32>
    %30 = arith.minsi %29, %28 : vector<1x300xi32>
    %31 = tpu.iota {dimensions = array<i32: 0>} : vector<16x300xi32>
    %32 = vector.broadcast %30 : vector<1x300xi32> to vector<16x300xi32>
    %33 = arith.cmpi eq, %31, %32 : vector<16x300xi32>
    %34 = arith.extui %33 : vector<16x300xi1> to vector<16x300xi32>
    %35 = arith.sitofp %34 : vector<16x300xi32> to vector<16x300xf32>
    %36 = tpu.concatenate %20, %13 in 0 : vector<1x300xf32>, vector<1x300xf32> -> vector<2x300xf32>
    %cst_7 = arith.constant dense<0.000000e+00> : vector<2x16xf32>
    %37 = tpu.matmul %36, %35, %cst_7 {dimension_numbers = #tpu.dot_dimension_numbers<[1], [1], [0], [0], [0, 0, 1, 0], [], []>} : vector<2x300xf32>, vector<16x300xf32>, vector<2x16xf32> -> vector<2x16xf32>
    %cst_8 = arith.constant 0.000000e+00 : f32
    %38 = vector.broadcast %cst_8 : f32 to vector<2x112xf32>
    %39 = tpu.concatenate %37, %38 in 1 : vector<2x16xf32>, vector<2x112xf32> -> vector<2x128xf32>
    %c0_i32_9 = arith.constant 0 : i32
    %40 = arith.cmpi eq, %arg0, %c0_i32_9 : i32
    %41 = arith.extui %40 : i1 to i32
    %c0_i32_10 = arith.constant 0 : i32
    %42 = arith.cmpi ne, %41, %c0_i32_10 : i32
    scf.if %42 {
      %cst_15 = arith.constant 0.000000e+00 : f32
      %46 = vector.broadcast %cst_15 : f32 to vector<2x128xf32>
      %c0_16 = arith.constant 0 : index
      %c0_17 = arith.constant 0 : index
      %47 = vector.load %arg3[%c0_16, %c0_17] : memref<2x128xf32, #tpu.memory_space<vmem>>, vector<2x128xf32>
      tpu.vector_store %arg3[%c0_16, %c0_17], %46 {strides = array<i32>} : memref<2x128xf32, #tpu.memory_space<vmem>>, vector<2x128xf32>,
    } else {
    }
    %c0_11 = arith.constant 0 : index
    %c0_12 = arith.constant 0 : index
    %43 = vector.load %arg3[%c0_11, %c0_12] : memref<2x128xf32, #tpu.memory_space<vmem>>, vector<2x128xf32>
    %44 = arith.addf %43, %39 : vector<2x128xf32>
    %c0_13 = arith.constant 0 : index
    %c0_14 = arith.constant 0 : index
    %45 = vector.load %arg3[%c0_13, %c0_14] : memref<2x128xf32, #tpu.memory_space<vmem>>, vector<2x128xf32>
    tpu.vector_store %arg3[%c0_13, %c0_14], %44 {strides = array<i32>} : memref<2x128xf32, #tpu.memory_space<vmem>>, vector<2x128xf32>,
    return
  }
  func.func @transform_0(%arg0: i32) -> (i32, i32) {
    %c0_i32 = arith.constant 0 : i32
    %c0_i32_0 = arith.constant 0 : i32
    return %c0_i32, %arg0 : i32, i32
  }
  func.func @transform_1(%arg0: i32) -> (i32, i32) {
    %c0_i32 = arith.constant 0 : i32
    %c0_i32_0 = arith.constant 0 : i32
    return %c0_i32, %arg0 : i32, i32
  }
  func.func @transform_2(%arg0: i32) -> (i32, i32) {
    %c0_i32 = arith.constant 0 : i32
    %c0_i32_0 = arith.constant 0 : i32
    %c0_i32_1 = arith.constant 0 : i32
    return %c0_i32, %c0_i32_0 : i32, i32
  }
}

</mosaic_0001>

<bundles_post_ra>
// kernel: tpu_custom_call.1
= control target key start
LH: loop header
LB: loop body
LE: loop exit
PB: predicated region body
PF: predicated region fallthrough
CT: control target
= control target key end

     0   :  { %7 = vsyncpa [#allocation3], 0  ;;  %s642_s0 = inlined_call_operand.hbm [shape: f32[10,300], index: 0, kind: input, shape index: {}]   ;;  %s643_s1 = inlined_call_operand.hbm [shape: s32[1,300], index: 1, kind: input, shape index: {}]   ;;  %s644_s2 = inlined_call_operand.hbm [shape: f32[2,128], index: 2, kind: output, shape index: {}]  }
   0x1   :  { %8 = vsyncpa [#allocation6], 0 }
   0x2   :  { %9 = vsyncpa [#allocation4], 0  ;;  %s14_s11 = sshll.u32 %s642_s0, 4  ;;  %s509_s12 = smov [#allocation2]   ;;  %s15_s11 = int_to_ptr.hbm [resolvable:$true] %s14_s11 }
   0x3   :  { %s16_s13 = sshll.u32 %s509_s12, 4  ;;  %s28_s16 = sshll.u32 %s643_s1, 4  ;;  %s17_s13 = int_to_ptr.vmem [resolvable:$true] %s16_s13  ;;  %s29_s16 = int_to_ptr.hbm [resolvable:$true] %s28_s16 }
   0x4   :  { %s510_s17 = smov 384   ;;  %s511_s18 = smov 24  }
   0x5   :  { %22 = dma.hbm_to_vmem [thread:$0]  %s15_s11, 768, %s17_s13, [#allocation3], %s510_s17, %s510_s17, %s511_s18  }
   0x6   :  { %s512_s19 = smov [#allocation5]  }
   0x7   :  { %s30_s20 = sshll.u32 %s512_s19, 4  ;;  %s31_s20 = int_to_ptr.vmem [resolvable:$true] %s30_s20 }
   0x8   :  { %33 = dma.hbm_to_vmem [thread:$0]  %s29_s16, 48, %s31_s20, [#allocation6]  }
   0x9   :  { %503 = dma.done.wait [#allocation3], 768  }
   0xa   :  { %504 = vsyncadd [#allocation3], 4294966528 }
   0xb   :  { %505 = dma.done.wait [#allocation6], 48  }
   0xc   :  { %506 = vsyncadd [#allocation6], 4294967248  ;;  %v513_v0 = vmov 0.0   ;;  %vm66_vm0 = vcmask 359424   ;;  %vm68_vm1 = vcmask 353280   ;;  %vm49_vm2 = vcmask 1041408  }
   0xd   :  { %359 = vst [vmem:[#allocation7] sm:$0x3] %v513_v0  ;;  %v44_v1 = vld [vmem:[#allocation2 + $0x10] sm:$0xff]  ;;  %v47_v2 = vld [vmem:[#allocation2 + $0x28] sm:$0x3]  ;;  %v538_v3 = vld [vmem:[#allocation2] sm:$0xff]  ;;  %v77_v34 = vlaneseq }
   0xe   :  { %v67_v4 = vsel %vm66_vm0, %v44_v1, -inf  ;;  %v69_v5 = vsel %vm68_vm1, %v47_v2, -inf  ;;  %v542_v6 = vld [vmem:[#allocation2 + $0x18] sm:$0x3]  ;;  %v544_v7 = vld [vmem:[#allocation2 + $0x8] sm:$0xff]  ;;  %s515_s0 = smov [#allocation7]  }
   0xf   :  { %v70_v8 = vmax.f32 %v67_v4, %v69_v5  ;;  %v50_v9 = vsel %vm49_vm2, %v542_v6, -inf  ;;  %v548_v10 = vld [vmem:[#allocation2 + $0x20] sm:$0x3]  ;;  %v562_v44 = vshrl.u32 %v77_v34, 7  ;;  %s368_s1 = sshll.u32 %s515_s0, 4  ;;  %s370_s23 = sshll.u32 %s644_s2, 4  ;;  %s369_s1 = int_to_ptr.vmem [resolvable:$true] %s368_s1  ;;  %s371_s23 = int_to_ptr.hbm [resolvable:$true] %s370_s23 }
  0x10   :  { %v51_v11 = vmax.f32 %v538_v3, %v50_v9  ;;  %v58_v12 = vsel %vm49_vm2, %v548_v10, -inf }
  0x11   :  { %v71_v13 = vrot.slane %v70_v8, 4  ;;  %v59_v14 = vmax.f32 %v544_v7, %v58_v12  ;;  %v565_v46 = vadd.s32 8, %v562_v44 }
  0x12   :  { %v52_v15 = vrot.slane %v51_v11, 4 }
  0x13   :  { %v72_v16 = vmax.f32 %v70_v8, %v71_v13  ;;  %v60_v17 = vrot.slane %v59_v14, 4 }
  0x14   :  { %v53_v18 = vmax.f32 %v51_v11, %v52_v15 }
  0x15   :  { %v73_v19 = vrot.slane %v72_v16, 2  ;;  %v61_v20 = vmax.f32 %v59_v14, %v60_v17 }
  0x16   :  { %v54_v21 = vrot.slane %v53_v18, 2 }
  0x17   :  { %v74_v22 = vmax.f32 %v72_v16, %v73_v19  ;;  %v62_v23 = vrot.slane %v61_v20, 2 }
  0x18   :  { %v55_v24 = vmax.f32 %v53_v18, %v54_v21 }
  0x19   :  { %v75_v25 = vrot.slane %v74_v22, 1  ;;  %v63_v26 = vmax.f32 %v61_v20, %v62_v23 }
  0x1a   :  { %v56_v27 = vrot.slane %v55_v24, 1 }
  0x1b   :  { %v76_v28 = vmax.f32 %v74_v22, %v75_v25  ;;  %v64_v29 = vrot.slane %v63_v26, 1 }
  0x1c   :  { %v57_v30 = vmax.f32 %v55_v24, %v56_v27 }
  0x1d   :  { %v143_v31 = vsub.f32 %v44_v1, %v76_v28  ;;  %v146_v32 = vsub.f32 %v47_v2, %v76_v28  ;;  %v554_v33 = vmax.f32 %v63_v26, %v64_v29  ;;  %vm82_vm3 = vcmp.eq.f32.partialorder %v44_v1, %v76_v28 }
  0x1e   :  { %v141_v35 = vsub.f32 %v538_v3, %v57_v30  ;;  %v144_v36 = vsub.f32 %v542_v6, %v57_v30  ;;  %vm85_vm4 = vcmp.eq.f32.partialorder %v47_v2, %v76_v28  ;;  %v88_v54 = vsel %vm82_vm3, %v562_v44, 10 }
  0x1f   :  { %v151_v37 = vmul.f32 1.442695, %v143_v31  ;;  %v157_v38 = vmul.f32 1.442695, %v146_v32  ;;  %v142_v39 = vsub.f32 %v544_v7, %v554_v33  ;;  %v145_v40 = vsub.f32 %v548_v10, %v554_v33 }
  0x20   :  { %v147_v41 = vmul.f32 1.442695, %v141_v35  ;;  %v153_v42 = vmul.f32 1.442695, %v144_v36  ;;  %v91_v55 = vsel %vm85_vm4, %v565_v46, 10  ;;  %vm83_vm6 = vcmp.eq.f32.partialorder %v542_v6, %v57_v30 }
  0x21   :  { %413 = vpow2.f32 %v151_v37  ;;  %v149_v43 = vmul.f32 1.442695, %v142_v39  ;;  %v155_v45 = vmul.f32 1.442695, %v145_v40  ;;  %v116_v58 = vsel %vm66_vm0, %v88_v54, 2147483647 }
  0x22   :  { %415 = vpow2.f32 %v157_v38  ;;  %v117_v59 = vsel %vm68_vm1, %v91_v55, 2147483647  ;;  %vm80_vm7 = vcmp.eq.f32.partialorder %v538_v3, %v57_v30  ;;  %v89_v9 = vsel %vm83_vm6, %v565_v46, 10 }
  0x23   :  { %417 = vpow2.f32 %v147_v41  ;;  %vm118_vm5 = vcmp.lt.s32.totalorder %v116_v58, %v117_v59  ;;  %v86_v14 = vsel %vm80_vm7, %v562_v44, 10  ;;  %v92_v15 = vsel %vm49_vm2, %v89_v9, 2147483647 }
  0x24   :  { %419 = vpow2.f32 %v153_v42  ;;  %v119_v1 = vsel %vm118_vm5, %v116_v58, %v117_v59  ;;  %vm84_vm9 = vcmp.eq.f32.partialorder %v548_v10, %v554_v33  ;;  %vm93_vm10 = vcmp.lt.s32.totalorder %v86_v14, %v92_v15 }
  0x25   :  { %421 = vpow2.f32 %v149_v43  ;;  %v120_v8 = vrot.slane %v119_v1, 4  ;;  %vm81_vm11 = vcmp.eq.f32.partialorder %v544_v7, %v554_v33  ;;  %v90_v21 = vsel %vm84_vm9, %v565_v46, 10 }
  0x26   :  { %423 = vpow2.f32 %v155_v45  ;;  %v94_v22 = vsel %vm93_vm10, %v86_v14, %v92_v15  ;;  %v87_v10 = vsel %vm81_vm11, %v562_v44, 10  ;;  %v104_v27 = vsel %vm49_vm2, %v90_v21, 2147483647 }
  0x27   :  { %v414_v47 = vpop.eup %413  ;;  %vm121_vm8 = vcmp.lt.s32.totalorder %v119_v1, %v120_v8  ;;  %v95_v28 = vrot.slane %v94_v22, 4  ;;  %vm105_vm13 = vcmp.lt.s32.totalorder %v87_v10, %v104_v27 }
  0x28   :  { %v416_v48 = vpop.eup %415  ;;  %v175_v49 = vsel %vm66_vm0, %v414_v47, 0.0  ;;  %v122_v18 = vsel %vm121_vm8, %v119_v1, %v120_v8  ;;  %v106_v33 = vsel %vm105_vm13, %v87_v10, %v104_v27 }
  0x29   :  { %v418_v50 = vpop.eup %417  ;;  %v176_v51 = vsel %vm68_vm1, %v416_v48, 0.0  ;;  %v123_v26 = vrot.slane %v122_v18, 2  ;;  %vm96_vm14 = vcmp.lt.s32.totalorder %v94_v22, %v95_v28  ;;  %v107_v40 = vrot.slane %v106_v33, 4 }
  0x2a   :  { %v420_v52 = vpop.eup %419  ;;  %v177_v53 = vadd.f32 %v176_v51, %v175_v49  ;;  %v97_v32 = vsel %vm96_vm14, %v94_v22, %v95_v28 }
  0x2b   :  { %v422_v56 = vpop.eup %421  ;;  %v159_v57 = vsel %vm49_vm2, %v420_v52, 0.0  ;;  %vm124_vm12 = vcmp.lt.s32.totalorder %v122_v18, %v123_v26  ;;  %v98_v38 = vrot.slane %v97_v32, 2  ;;  %vm108_vm3 = vcmp.lt.s32.totalorder %v106_v33, %v107_v40 }
  0x2c   :  { %v424_v60 = vpop.eup %423  ;;  %v178_v61 = vrot.slane %v177_v53, 4  ;;  %v160_v62 = vadd.f32 %v418_v50, %v159_v57  ;;  %v587_v31 = vsel %vm124_vm12, %v122_v18, %v123_v26  ;;  %v109_v50 = vsel %vm108_vm3, %v106_v33, %v107_v40 }
  0x2d   :  { %v167_v63 = vsel %vm49_vm2, %v424_v60, 0.0  ;;  %v126_v39 = vrot.slane %v587_v31, 1  ;;  %vm99_vm5 = vcmp.lt.s32.totalorder %v97_v32, %v98_v38  ;;  %v110_v55 = vrot.slane %v109_v50, 2 }
  0x2e   :  { %v179_v2 = vadd.f32 %v178_v61, %v177_v53  ;;  %v161_v4 = vrot.slane %v160_v62, 4  ;;  %v168_v5 = vadd.f32 %v422_v56, %v167_v63  ;;  %v100_v61 = vsel %vm99_vm5, %v97_v32, %v98_v38 }
  0x2f   :  { %vm111_vm9 = vcmp.lt.s32.totalorder %v109_v50, %v110_v55  ;;  %vm127_vm14 = vcmp.lt.s32.totalorder %v587_v31, %v126_v39 }
  0x30   :  { %v180_v11 = vrot.slane %v179_v2, 2  ;;  %v162_v12 = vadd.f32 %v161_v4, %v160_v62  ;;  %v169_v13 = vrot.slane %v168_v5, 4 }
  0x32   :  { %v181_v6 = vadd.f32 %v180_v11, %v179_v2  ;;  %v163_v16 = vrot.slane %v162_v12, 2  ;;  %v170_v17 = vadd.f32 %v169_v13, %v168_v5  ;;  %v101_v11 = vrot.slane %v100_v61, 1 }
  0x34   :  { %v182_v3 = vrot.slane %v181_v6, 1  ;;  %v164_v19 = vadd.f32 %v163_v16, %v162_v12  ;;  %v171_v20 = vrot.slane %v170_v17, 2  ;;  %v112_v12 = vsel %vm111_vm9, %v109_v50, %v110_v55 }
  0x36   :  { %v183_v23 = vadd.f32 %v182_v3, %v181_v6  ;;  %v165_v24 = vrot.slane %v164_v19, 1  ;;  %v172_v25 = vadd.f32 %v171_v20, %v170_v17  ;;  %v48_v6 = vld [vmem:[#allocation5] sm:$0x7] }
  0x37   :  { %v131_v22 = vperm.slane %v48_v6, 2  ;;  %v129_v27 = vperm.slane %v48_v6, 0  ;;  %v130_v33 = vperm.slane %v48_v6, 1 }
  0x38   :  { %425 = vrcp.f32 %v183_v23  ;;  %v166_v29 = vadd.f32 %v165_v24, %v164_v19  ;;  %v173_v30 = vrot.slane %v172_v25, 1  ;;  %v223_v35 = vand.u32 2147483647, %v183_v23 }
  0x39   :  { %v225_v36 = vand.u32 2147483648, %v183_v23  ;;  %vm219_vm15 = vweird.f32 %v183_v23  ;;  %v113_v19 = vrot.slane %v112_v12, 1 }
  0x3a   :  { %427 = vrcp.f32 %v166_v29  ;;  %v174_v7 = vadd.f32 %v173_v30, %v172_v25  ;;  %v195_v43 = vand.u32 2147483648, %v166_v29  ;;  %vm590_vm2 = vcmp.eq.f32.partialorder %v223_v35, 8.507059e+37 }
  0x3b   :  { %v226_v47 = vor.u32 1.1754944e-38, %v225_v36  ;;  %vm189_vm4 = vweird.f32 %v166_v29  ;;  %v193_v54 = vand.u32 2147483647, %v166_v29  ;;  %v128_v25 = vsel %vm127_vm14, %v587_v31, %v126_v39 }
  0x3c   :  { %429 = vrcp.f32 %v174_v7  ;;  %v196_v57 = vor.u32 1.1754944e-38, %v195_v43  ;;  %vm204_vm8 = vweird.f32 %v174_v7  ;;  %v210_v60 = vand.u32 2147483648, %v174_v7 }
  0x3d   :  { %v208_v2 = vand.u32 2147483647, %v174_v7  ;;  %vm194_vm12 = vcmp.eq.f32.partialorder %v193_v54, 8.507059e+37  ;;  %vm280_vm14 = vcmask 1040384  }
  0x3e   :  { %v426_v34 = vpop.eup %425  ;;  %v211_v15 = vor.u32 1.1754944e-38, %v210_v60 }
  0x3f   :  { %v215_v37 = vmul.f32 %v426_v34, %v183_v23  ;;  %vm220_vm1 = vweird.f32 %v426_v34 }
  0x40   :  { %v428_v41 = vpop.eup %427  ;;  %vm594_vm6 = vmor %vm219_vm15, %vm220_vm1  ;;  %vm209_vm15 = vcmp.eq.f32.partialorder %v208_v2, 8.507059e+37  ;;  %vm102_vm1 = vcmp.lt.s32.totalorder %v100_v61, %v101_v11 }
  0x41   :  { %v216_v42 = vsub.f32 1.0, %v215_v37  ;;  %v185_v48 = vmul.f32 %v428_v41, %v166_v29  ;;  %vm190_vm7 = vweird.f32 %v428_v41  ;;  %v103_v29 = vsel %vm102_vm1, %v100_v61, %v101_v11 }
  0x42   :  { %v430_v51 = vpop.eup %429  ;;  %vm601_vm10 = vmor %vm189_vm4, %vm190_vm7  ;;  %vm134_vm4 = vcmp.eq.s32.totalorder %v128_v25, %v131_v22 }
  0x43   :  { %v217_v49 = vmul.f32 %v426_v34, %v216_v42  ;;  %v186_v53 = vsub.f32 1.0, %v185_v48  ;;  %v200_v58 = vmul.f32 %v430_v51, %v174_v7  ;;  %vm205_vm11 = vweird.f32 %v430_v51 }
  0x44   :  { %vm613_vm13 = vmor %vm204_vm8, %vm205_vm11  ;;  %v383_v31 = vsel %vm134_vm4, 1.0, %v513_v0  ;;  %vm353_vm4 = vcmask 130048  }
  0x45   :  { %v218_v56 = vadd.f32 %v426_v34, %v217_v49  ;;  %v187_v59 = vmul.f32 %v428_v41, %v186_v53  ;;  %v201_v1 = vsub.f32 1.0, %v200_v58  ;;  %v276_v42 = vrot.slane %v383_v31, 7  ;;  %v360_v58 = vld [vmem:[#allocation7] sm:$0x3] }
  0x47   :  { %v222_v62 = vsel %vm594_vm6, %v426_v34, %v218_v56  ;;  %v188_v5 = vadd.f32 %v428_v41, %v187_v59  ;;  %v202_v9 = vmul.f32 %v430_v51, %v201_v1  ;;  %vm132_vm6 = vcmp.eq.s32.totalorder %v103_v29, %v129_v27 }
  0x48   :  { %v607_v4 = vsel %vm590_vm2, %v226_v47, %v222_v62  ;;  %vm114_vm2 = vcmp.lt.s32.totalorder %v112_v12, %v113_v19  ;;  %v381_v40 = vsel %vm132_vm6, 1.0, %v513_v0  ;;  %v514_v47 = vmov 1.0  }
  0x49   :  { %v231_v8 = vmul.f32 15.0, %v607_v4  ;;  %v192_v13 = vsel %vm601_vm10, %v428_v41, %v188_v5  ;;  %v203_v18 = vadd.f32 %v430_v51, %v202_v9  ;;  %v115_v35 = vsel %vm114_vm2, %v112_v12, %v113_v19 }
  0x4a   :  { %v197_v17 = vsel %vm194_vm12, %v196_v57, %v192_v13  ;;  %vm133_vm11 = vcmp.eq.s32.totalorder %v115_v35, %v130_v33  ;;  %v274_v48 = vrot.slane %v381_v40, 7 }
  0x4b   :  { %v234_v16 = vceil.f32 %v231_v8  ;;  %v229_v3 = vmul.f32 15.0, %v197_v17  ;;  %v207_v21 = vsel %vm613_vm13, %v430_v51, %v203_v18  ;;  %v382_v49 = vsel %vm133_vm11, 1.0, %v513_v0 }
  0x4c   :  { %v212_v24 = vsel %vm209_vm15, %v211_v15, %v207_v21  ;;  %v283_v51 = vsel %vm280_vm14, %v607_v4, %v276_v42  ;;  %v275_v52 = vrot.slane %v382_v49, 7  ;;  %v281_v53 = vsel %vm280_vm14, %v197_v17, %v274_v48 }
  0x4d   :  { %v405_v20 = vcvt.f32.s32 %v234_v16  ;;  %v232_v23 = vceil.f32 %v229_v3  ;;  %v230_v10 = vmul.f32 15.0, %v212_v24 }
  0x4f   :  { %v386_v26 = vadd.s32 4294967295, %v405_v20  ;;  %v401_v28 = vcvt.f32.s32 %v232_v23  ;;  %v233_v30 = vceil.f32 %v230_v10 }
  0x51   :  { %vm245_vm3 = vcmp.gt.s32.totalorder %v386_v26, 0  ;;  %v384_v32 = vadd.s32 4294967295, %v401_v28  ;;  %v403_v34 = vcvt.f32.s32 %v233_v30 }
  0x52   :  { %v246_v7 = vsel %vm245_vm3, %v386_v26, 0 }
  0x53   :  { %vm251_vm5 = vcmp.lt.s32.totalorder %v246_v7, 14  ;;  %vm241_vm7 = vcmp.gt.s32.totalorder %v384_v32, 0  ;;  %v385_v38 = vadd.s32 4294967295, %v403_v34 }
  0x54   :  { %v252_v36 = vsel %vm251_vm5, %v246_v7, 14  ;;  %v242_v37 = vsel %vm241_vm7, %v384_v32, 0 }
  0x55   :  { %vm258_vm8 = vcmp.eq.s32.totalorder %v565_v46, %v252_v36  ;;  %vm255_vm9 = vcmp.eq.s32.totalorder %v562_v44, %v252_v36  ;;  %vm247_vm10 = vcmp.lt.s32.totalorder %v242_v37, 14  ;;  %vm243_vm12 = vcmp.gt.s32.totalorder %v385_v38, 0 }
  0x56   :  { %v392_v39 = vsel %vm258_vm8, 1.0, %v513_v0  ;;  %v248_v41 = vsel %vm247_vm10, %v242_v37, 14  ;;  %v244_v43 = vsel %vm243_vm12, %v385_v38, 0  ;;  %v389_v45 = vsel %vm255_vm9, 1.0, %v513_v0 }
  0x57   :  { %397 = vmatpush.xpose.msk.msra.mxu2 %vm66_vm0, %v392_v39  ;;  %vm256_vm13 = vcmp.eq.s32.totalorder %v565_v46, %v248_v41  ;;  %vm249_vm15 = vcmp.lt.s32.totalorder %v244_v43, 14  ;;  %vm253_vm1 = vcmp.eq.s32.totalorder %v562_v44, %v248_v41  ;;  %v282_v0 = vsel %vm280_vm14, %v212_v24, %v275_v52 }
  0x58   :  { %393 = vmatpush.xpose.msk.msra.mxu0 %vm256_vm13, %v514_v47  ;;  %v250_v50 = vsel %vm249_vm15, %v244_v43, 14 }
  0x59   :  { %vm257_vm2 = vcmp.eq.s32.totalorder %v565_v46, %v250_v50  ;;  %vm254_vm3 = vcmp.eq.s32.totalorder %v562_v44, %v250_v50 }
  0x5a   :  { %395 = vmatpush.xpose.msk.msra.mxu1 %vm257_vm2, %v514_v47 }
  0x5b   :  { %398 = vmatpush.xpose.msk.msra.mxu2 %vm66_vm0, %v389_v45 }
  0x5c   :  { %394 = vmatpush.xpose.msk.msra.mxu0 %vm253_vm1, %v514_v47 }
  0x5e   :  { %399 = vmatmul.msk.f32.vlgmr.msra.gmra.mxu2 %vm66_vm0, %v283_v51  ;;  %396 = vmatpush.xpose.msk.msra.mxu1 %vm254_vm3, %v514_v47 }
  0x5f   :  { %309 = vmatmul.f32.vlgmr.msra.gmra.mxu0 %v281_v53 }
  0x61   :  { %329 = vmatmul.f32.vlgmr.msra.gmra.mxu1 %v282_v0 }
  0xdc   :  { %v310_v46 = vpop.f32.mrf.mxu0 }
  0xde   :  { %v330_v54 = vpop.f32.mrf.mxu1 }
  0xdf   :  { %v331_v55 = vadd.f32 %v330_v54, %v310_v46 }
  0xe1   :  { %v350_v56 = vpop.f32.mrf.mxu2 }
  0xe2   :  { %v351_v57 = vadd.f32 %v350_v56, %v331_v55 }
  0xe4   :  { %v354_v44 = vsel %vm353_vm4, %v351_v57, 0.0 }
  0xe5   :  { %v361_v59 = vadd.f32 %v360_v58, %v354_v44 }
  0xe7   :  { %362 = vst [vmem:[#allocation7] sm:$0x3] %v361_v59 }
  0xe8   :  { %373 = dma.vmem_to_hbm [thread:$0]  %s369_s1, 32, %s371_s23, [#allocation4]  }
  0xe9   :  { %507 = dma.done.wait [#allocation4], 32  }
  0xea   :  { %508 = vsyncadd [#allocation4], 4294967264 }
  0xeb   :  { %378 = vsyncpa [#allocation3], 1 }
  0xec   :  { %379 = vsyncpa [#allocation6], 1 }
  0xed   :  { %380 = vsyncpa [#allocation4], 1 }

</bundles_post_ra>
